<compile_context>
chip_gen: v5e
topology: v5e:2x2
jax: 0.10.0
libtpu: 0.0.40
codegen_flags: <defaults>
</compile_context>

<pallas_src>
import math
import jax
import jax.numpy as jnp
from jax.experimental import pallas as pl
from jax.experimental.pallas import tpu as pltpu

NEG_SLOPE = 0.01  # nn.LeakyReLU() default
LANE = 128
SUBLANE = 8


def _round_up(n, m):
    return ((n + m - 1) // m) * m


def _net_kernel(x_ref, w1_ref, b1_ref, w2_ref, b2_ref, out_ref):
    # x: (TB, K), w1: (K, H_pad), b1: (1, H_pad)
    # w2: (H_pad, NA_pad), b2: (1, NA_pad), out: (TB, NA_pad)
    x = x_ref[...]
    h = jnp.dot(x, w1_ref[...], preferred_element_type=jnp.float32) + b1_ref[...]
    # LeakyReLU: single vmul + vmax on the VPU. Padded hidden columns are
    # exactly 0 (zero weights + zero bias), LeakyReLU(0)=0, so padding is inert.
    h = jnp.maximum(h, NEG_SLOPE * h)
    out = jnp.dot(h, w2_ref[...], preferred_element_type=jnp.float32) + b2_ref[...]
    out_ref[...] = out.astype(out_ref.dtype)


def net_forward(x, w1, b1, w2, b2, *, batch_tile=256):
    """x: (B, num_state) f32, w1: (num_state, H), b1: (1, H) or (H,),
    w2: (H, num_action), b2: (1, num_action) or (num_action,)
    -> (B, num_action) f32."""
    B, K = x.shape
    H = w1.shape[1]
    NA = w2.shape[1]

    # ---- pad to TPU-friendly shapes (lane width 128, sublane 8) ----
    H_pad = _round_up(H, LANE)     # 100 -> 128: lane-dense hidden activation
    NA_pad = _round_up(NA, LANE)   # lane-dense output store (no vst.msk)
    TB = min(batch_tile, _round_up(B, SUBLANE))
    B_pad = _round_up(B, TB)

    xp = jnp.pad(x, ((0, B_pad - B), (0, 0)))
    w1p = jnp.pad(w1, ((0, 0), (0, H_pad - H)))
    b1p = jnp.pad(jnp.reshape(b1, (1, H)), ((0, 0), (0, H_pad - H)))
    w2p = jnp.pad(w2, ((0, H_pad - H), (0, NA_pad - NA)))
    b2p = jnp.pad(jnp.reshape(b2, (1, NA)), ((0, 0), (0, NA_pad - NA)))

    grid = (B_pad // TB,)
    flops = 2 * B_pad * (K * H_pad + H_pad * NA_pad)
    bytes_accessed = 4 * (B_pad * K + K * H_pad + H_pad
                          + H_pad * NA_pad + NA_pad + B_pad * NA_pad)

    out_pad = pl.pallas_call(
        _net_kernel,
        out_shape=jax.ShapeDtypeStruct((B_pad, NA_pad), jnp.float32),
        grid=grid,
        in_specs=[
            pl.BlockSpec((TB, K), lambda i: (i, 0)),          # x: tiled over batch
            pl.BlockSpec((K, H_pad), lambda i: (0, 0)),       # w1: resident
            pl.BlockSpec((1, H_pad), lambda i: (0, 0)),       # b1: resident
            pl.BlockSpec((H_pad, NA_pad), lambda i: (0, 0)),  # w2: resident
            pl.BlockSpec((1, NA_pad), lambda i: (0, 0)),      # b2: resident
        ],
        out_specs=pl.BlockSpec((TB, NA_pad), lambda i: (i, 0)),
        compiler_params=pltpu.CompilerParams(
            dimension_semantics=("parallel",)),
        cost_estimate=pl.CostEstimate(
            flops=flops, transcendentals=0, bytes_accessed=bytes_accessed),
    )(xp, w1p, b1p, w2p, b2p)

    return out_pad[:B, :NA]


def init_params(key, num_state, num_action, hidden=100):
    """Deterministic init mimicking PyTorch nn.Linear's U(-1/sqrt(fan_in), 1/sqrt(fan_in)).
    Weights are stored as (in, out) = transposed PyTorch weight."""
    k1, k2, k3, k4 = jax.random.split(key, 4)
    bound1 = 1.0 / math.sqrt(num_state)
    bound2 = 1.0 / math.sqrt(hidden)
    w1 = jax.random.uniform(k1, (num_state, hidden), jnp.float32, -bound1, bound1)
    b1 = jax.random.uniform(k2, (1, hidden), jnp.float32, -bound1, bound1)
    w2 = jax.random.uniform(k3, (hidden, num_action), jnp.float32, -bound2, bound2)
    b2 = jax.random.uniform(k4, (1, num_action), jnp.float32, -bound2, bound2)
    return w1, b1, w2, b2


def net_reference(x, w1, b1, w2, b2):
    h = x @ w1 + b1
    h = jnp.where(h > 0, h, NEG_SLOPE * h)
    return h @ w2 + b2


if __name__ == "__main__":
    key = jax.random.PRNGKey(0)
    num_state, num_action, batch = 4, 2, 8  # CartPole-like DQN dims

    kx, kp = jax.random.split(key)
    x = jax.random.normal(kx, (batch, num_state), jnp.float32)
    w1, b1, w2, b2 = init_params(kp, num_state, num_action)

    out = net_forward(x, w1, b1, w2, b2)
    out = jax.block_until_ready(out)

    ref = net_reference(x, w1, b1, w2, b2)
    assert out.shape == (batch, num_action)
    assert jnp.allclose(out, ref, atol=1e-5, rtol=1e-5), "mismatch vs reference"

    # also exercise a training-sized, multi-tile batch path
    xb = jax.random.normal(kx, (600, num_state), jnp.float32)
    outb = jax.block_until_ready(net_forward(xb, w1, b1, w2, b2))
    refb = net_reference(xb, w1, b1, w2, b2)
    assert outb.shape == (600, num_action)
    assert jnp.allclose(outb, refb, atol=1e-5, rtol=1e-5), "mismatch (batched)"

    print("KERNEL_OK")
</pallas_src>

<mosaic_0001>
module attributes {stable_mosaic.version = 11 : i64} {
  func.func @_net_kernel(%arg0: i32, %arg1: memref<8x4xf32, #tpu.memory_space<vmem>>, %arg2: memref<4x128xf32, #tpu.memory_space<vmem>>, %arg3: memref<1x128xf32, #tpu.memory_space<vmem>>, %arg4: memref<128x128xf32, #tpu.memory_space<vmem>>, %arg5: memref<1x128xf32, #tpu.memory_space<vmem>>, %arg6: memref<8x128xf32, #tpu.memory_space<vmem>>) attributes {dimension_semantics = [#tpu.dimension_semantics<parallel>], iteration_bounds = array<i64: 1>, scalar_prefetch = 0 : i64, scratch_operands = 0 : i64, tpu.core_type = #tpu.core_type<tc>, window_params = [{transform_indices = @transform_0, window_bounds = array<i64: 8, 4>}, {pipeline_mode = #tpu.pipeline_mode<synchronous>, transform_indices = @transform_1, window_bounds = array<i64: 4, 128>}, {pipeline_mode = #tpu.pipeline_mode<synchronous>, transform_indices = @transform_2, window_bounds = array<i64: 1, 128>}, {pipeline_mode = #tpu.pipeline_mode<synchronous>, transform_indices = @transform_3, window_bounds = array<i64: 128, 128>}, {pipeline_mode = #tpu.pipeline_mode<synchronous>, transform_indices = @transform_4, window_bounds = array<i64: 1, 128>}, {transform_indices = @transform_5, window_bounds = array<i64: 8, 128>}]} {
    %c0 = arith.constant 0 : index
    %c0_0 = arith.constant 0 : index
    %0 = vector.load %arg1[%c0, %c0_0] : memref<8x4xf32, #tpu.memory_space<vmem>>, vector<8x4xf32>
    %c0_1 = arith.constant 0 : index
    %c0_2 = arith.constant 0 : index
    %1 = vector.load %arg2[%c0_1, %c0_2] : memref<4x128xf32, #tpu.memory_space<vmem>>, vector<4x128xf32>
    %cst = arith.constant dense<0.000000e+00> : vector<8x128xf32>
    %2 = tpu.matmul %0, %1, %cst {dimension_numbers = #tpu.dot_dimension_numbers<[1], [0], [0], [1], [0, 0, 1, 1], [], []>} : vector<8x4xf32>, vector<4x128xf32>, vector<8x128xf32> -> vector<8x128xf32>
    %c0_3 = arith.constant 0 : index
    %c0_4 = arith.constant 0 : index
    %3 = vector.load %arg3[%c0_3, %c0_4] : memref<1x128xf32, #tpu.memory_space<vmem>>, vector<1x128xf32>
    %4 = vector.broadcast %3 : vector<1x128xf32> to vector<8x128xf32>
    %5 = arith.addf %2, %4 : vector<8x128xf32>
    %cst_5 = arith.constant 0.00999999977 : f32
    %6 = vector.broadcast %cst_5 : f32 to vector<8x128xf32>
    %7 = arith.mulf %6, %5 : vector<8x128xf32>
    %8 = arith.maximumf %5, %7 : vector<8x128xf32>
    %c0_6 = arith.constant 0 : index
    %c0_7 = arith.constant 0 : index
    %9 = vector.load %arg4[%c0_6, %c0_7] : memref<128x128xf32, #tpu.memory_space<vmem>>, vector<128x128xf32>
    %cst_8 = arith.constant dense<0.000000e+00> : vector<8x128xf32>
    %10 = tpu.matmul %8, %9, %cst_8 {dimension_numbers = #tpu.dot_dimension_numbers<[1], [0], [0], [1], [0, 0, 1, 1], [], []>} : vector<8x128xf32>, vector<128x128xf32>, vector<8x128xf32> -> vector<8x128xf32>
    %c0_9 = arith.constant 0 : index
    %c0_10 = arith.constant 0 : index
    %11 = vector.load %arg5[%c0_9, %c0_10] : memref<1x128xf32, #tpu.memory_space<vmem>>, vector<1x128xf32>
    %12 = vector.broadcast %11 : vector<1x128xf32> to vector<8x128xf32>
    %13 = arith.addf %10, %12 : vector<8x128xf32>
    %c0_11 = arith.constant 0 : index
    %c0_12 = arith.constant 0 : index
    %14 = vector.load %arg6[%c0_11, %c0_12] : memref<8x128xf32, #tpu.memory_space<vmem>>, vector<8x128xf32>
    tpu.vector_store %arg6[%c0_11, %c0_12], %13 {strides = array<i32>} : memref<8x128xf32, #tpu.memory_space<vmem>>, vector<8x128xf32>,
    return
  }
  func.func @transform_0(%arg0: i32) -> (i32, i32) {
    %c0_i32 = arith.constant 0 : i32
    %c0_i32_0 = arith.constant 0 : i32
    return %arg0, %c0_i32 : i32, i32
  }
  func.func @transform_1(%arg0: i32) -> (i32, i32) {
    %c0_i32 = arith.constant 0 : i32
    %c0_i32_0 = arith.constant 0 : i32
    %c0_i32_1 = arith.constant 0 : i32
    return %c0_i32, %c0_i32_0 : i32, i32
  }
  func.func @transform_2(%arg0: i32) -> (i32, i32) {
    %c0_i32 = arith.constant 0 : i32
    %c0_i32_0 = arith.constant 0 : i32
    %c0_i32_1 = arith.constant 0 : i32
    return %c0_i32, %c0_i32_0 : i32, i32
  }
  func.func @transform_3(%arg0: i32) -> (i32, i32) {
    %c0_i32 = arith.constant 0 : i32
    %c0_i32_0 = arith.constant 0 : i32
    %c0_i32_1 = arith.constant 0 : i32
    return %c0_i32, %c0_i32_0 : i32, i32
  }
  func.func @transform_4(%arg0: i32) -> (i32, i32) {
    %c0_i32 = arith.constant 0 : i32
    %c0_i32_0 = arith.constant 0 : i32
    %c0_i32_1 = arith.constant 0 : i32
    return %c0_i32, %c0_i32_0 : i32, i32
  }
  func.func @transform_5(%arg0: i32) -> (i32, i32) {
    %c0_i32 = arith.constant 0 : i32
    %c0_i32_0 = arith.constant 0 : i32
    return %arg0, %c0_i32 : i32, i32
  }
}

</mosaic_0001>

<bundles_post_ra>
// kernel: tpu_custom_call.1
= control target key start
LH: loop header
LB: loop body
LE: loop exit
PB: predicated region body
PF: predicated region fallthrough
CT: control target
= control target key end

     0   :  { %10 = vsyncpa [#allocation3], 0  ;;  %s243_s0 = inlined_call_operand.vmem [shape: f32[8,4], index: 0, kind: input, shape index: {}]   ;;  %s244_s1 = inlined_call_operand.vmem [shape: f32[4,128], index: 1, kind: input, shape index: {}]   ;;  %s245_s2 = inlined_call_operand.vmem [shape: f32[1,128], index: 2, kind: input, shape index: {}]   ;;  %s246_s3 = inlined_call_operand.hbm [shape: f32[128,128], index: 3, kind: input, shape index: {}]   ;;  %s247_s4 = inlined_call_operand.vmem [shape: f32[1,128], index: 4, kind: input, shape index: {}]   ;;  %s248_s5 = inlined_call_operand.hbm [shape: f32[8,128], index: 5, kind: output, shape index: {}]  }
   0x1   :  { %11 = vsyncpa [#allocation4], 0  ;;  %s22_s20 = sshll.u32 %s246_s3, 4  ;;  %s191_s21 = smov [#allocation2]   ;;  %s23_s20 = int_to_ptr.hbm [resolvable:$true] %s22_s20 }
   0x2   :  { %s24_s22 = sshll.u32 %s191_s21, 4  ;;  %s192_s23 = smov 128   ;;  %s25_s22 = int_to_ptr.vmem [resolvable:$true] %s24_s22 }
   0x3   :  { %s193_s24 = smov 8  }
   0x4   :  { %30 = dma.hbm_to_vmem [thread:$0]  %s23_s20, 2048, %s25_s22, [#allocation3], %s192_s23, %s192_s23, %s193_s24  }
   0x5   :  { %187 = dma.done.wait [#allocation3], 2048  }
   0x6   :  { %188 = vsyncadd [#allocation3], 4294965248  ;;  %vm47_vm0 = vcmask 1043456   ;;  %vm43_vm1 = vcmask 31744   ;;  %v38_v0 = vld [vmem:[%s244_s1] sm:$0xf] }
   0x7   :  { %v37_v1 = vld [vmem:[%s243_s0] sm:$0xff]  ;;  %v88_v2 = vld [vmem:[#allocation2 + $0x78] sm:$0xff]  ;;  %131 = vmatpush.msk.msra.mxu0 %vm47_vm0, %v38_v0  ;;  %v87_v3 = vld [vmem:[#allocation2 + $0x70] sm:$0xff]  ;;  %s194_s30 = smov [#allocation5]   ;;  %s121_s9 = sshll.u32 %s248_s5, 4  ;;  %s122_s9 = int_to_ptr.hbm [resolvable:$true] %s121_s9 }
   0x8   :  { %93 = vmatpush.msra.mxu1 %v88_v2  ;;  %132 = vmatmul.msk.f32.vlgmr.msra.gmra.mxu0 %vm43_vm1, %v37_v1  ;;  %v86_v4 = vld [vmem:[#allocation2 + $0x68] sm:$0xff]  ;;  %v85_v5 = vld [vmem:[#allocation2 + $0x60] sm:$0xff]  ;;  %v84_v6 = vld [vmem:[#allocation2 + $0x58] sm:$0xff]  ;;  %s119_s6 = sshll.u32 %s194_s30, 4  ;;  %s120_s6 = int_to_ptr.vmem [resolvable:$true] %s119_s6 }
   0x9   :  { %v83_v7 = vld [vmem:[#allocation2 + $0x50] sm:$0xff]  ;;  %v82_v8 = vld [vmem:[#allocation2 + $0x48] sm:$0xff]  ;;  %v81_v9 = vld [vmem:[#allocation2 + $0x40] sm:$0xff] }
   0xa   :  { %94 = vmatpush.msra.mxu1 %v87_v3  ;;  %v80_v10 = vld [vmem:[#allocation2 + $0x38] sm:$0xff]  ;;  %v79_v11 = vld [vmem:[#allocation2 + $0x30] sm:$0xff]  ;;  %v78_v12 = vld [vmem:[#allocation2 + $0x28] sm:$0xff] }
   0xb   :  { %v77_v13 = vld [vmem:[#allocation2 + $0x20] sm:$0xff]  ;;  %v76_v14 = vld [vmem:[#allocation2 + $0x18] sm:$0xff]  ;;  %v75_v15 = vld [vmem:[#allocation2 + $0x10] sm:$0xff] }
   0xc   :  { %95 = vmatpush.msra.mxu1 %v86_v4  ;;  %v74_v16 = vld [vmem:[#allocation2 + $0x8] sm:$0xff]  ;;  %v73_v17 = vld [vmem:[#allocation2] sm:$0xff] }
   0xd   :  { %v137_v18 = vld [vmem:[%s245_s2] ss:$0 sm:$0xff] }
   0xe   :  { %96 = vmatpush.msra.mxu1 %v85_v5  ;;  %v138_v23 = vld [vmem:[%s247_s4] ss:$0 sm:$0xff] }
  0x10   :  { %97 = vmatpush.msra.mxu1 %v84_v6 }
  0x12   :  { %98 = vmatpush.msra.mxu1 %v83_v7 }
  0x14   :  { %99 = vmatpush.msra.mxu1 %v82_v8 }
  0x16   :  { %100 = vmatpush.msra.mxu1 %v81_v9 }
  0x18   :  { %101 = vmatpush.msra.mxu1 %v80_v10 }
  0x1a   :  { %102 = vmatpush.msra.mxu1 %v79_v11 }
  0x1c   :  { %103 = vmatpush.msra.mxu1 %v78_v12 }
  0x1e   :  { %104 = vmatpush.msra.mxu1 %v77_v13 }
  0x20   :  { %105 = vmatpush.msra.mxu1 %v76_v14 }
  0x22   :  { %106 = vmatpush.msra.mxu1 %v75_v15 }
  0x24   :  { %107 = vmatpush.msra.mxu1 %v74_v16 }
  0x26   :  { %108 = vmatpush.msra.mxu1 %v73_v17 }
  0x85   :  { %v68_v19 = vpop.f32.mrf.mxu0 }
  0x86   :  { %v69_v20 = vadd.f32 %v137_v18, %v68_v19 }
  0x88   :  { %v71_v21 = vmul.f32 0.01, %v69_v20 }
  0x8a   :  { %v72_v22 = vmax.f32 %v69_v20, %v71_v21 }
  0x8c   :  { %109 = vmatmul.f32.vlgmr.msra.gmra.mxu1 %v72_v22 }
 0x109   :  { %v110_v24 = vpop.f32.mrf.mxu1 }
 0x10a   :  { %v111_v25 = vadd.f32 %v138_v23, %v110_v24 }
 0x10c   :  { %113 = vst [vmem:[#allocation5] sm:$0xff] %v111_v25 }
 0x10d   :  { %124 = dma.vmem_to_hbm [thread:$0]  %s120_s6, 128, %s122_s9, [#allocation4]  }
 0x10e   :  { %189 = dma.done.wait [#allocation4], 128  }
 0x10f   :  { %190 = vsyncadd [#allocation4], 4294967168 }
 0x110   :  { %129 = vsyncpa [#allocation3], 1 }
 0x111   :  { %130 = vsyncpa [#allocation4], 1 }

</bundles_post_ra>
